<compile_context>
chip_gen: v7x
topology: tpu7x:2x2x1
jax: 0.10.0
libtpu: 0.0.40
codegen_flags: <defaults>
</compile_context>

<pallas_src>
import functools
import math

import jax
import jax.numpy as jnp
from jax import lax
from jax.experimental import pallas as pl
from jax.experimental.pallas import tpu as pltpu


def _mha_kernel(x_ref, wqkv_ref, bqkv_ref, wp_ref, bp_ref, o_ref, *,
                num_heads, seq_len, mxu_dtype, approx_recip):
    """One grid step: Bblk batch elements, rows laid out as (Bblk*n, F).

    fused QKV matmul -> one head-major relayout -> head-batched score and
    att@V dot_generals -> one head reassembly -> one output projection.
    """
    rows, F = x_ref.shape
    n = seq_len
    Bblk = rows // n
    H = num_heads
    d = F // H
    inv_scale = 1.0 / math.sqrt(float(F))

    def mxu(a, b, dn):
        # Feed the MXU in mxu_dtype (f32 default; bf16 on v6e/v7x), always
        # accumulate in f32.
        return lax.dot_general(a.astype(mxu_dtype), b.astype(mxu_dtype), dn,
                               preferred_element_type=jnp.float32)

    # ---- fused QKV projection: ONE MXU pass, (rows,F)@(F,3F) + (1,3F) bias.
    qkv = mxu(x_ref[...], wqkv_ref[...],
              (((1,), (0,)), ((), ()))) + bqkv_ref[...]            # (rows,3F) f32

    # ---- head-major relayout, done ONCE per operand (not per head per dot):
    #      (rows, 3F) -> (Bblk*H, n, d).  Row slices are 8-aligned sublane
    #      slices; lane slices are d-wide; stack is a leading-dim concat.
    def split_heads(col0):
        pieces = [qkv[b * n:(b + 1) * n, col0 + h * d: col0 + (h + 1) * d]
                  for b in range(Bblk) for h in range(H)]
        return jnp.stack(pieces, axis=0)                           # (Bblk*H,n,d)

    q = split_heads(0)
    k = split_heads(F)
    v = split_heads(2 * F)

    # ---- scores for ALL (batch, head) pairs in ONE batched dot_general,
    #      contracting the last dim of BOTH operands (no explicit K^T).
    s = mxu(q, k, (((2,), (2,)), ((0,), (0,))))                    # (Bblk*H,n,n)

    # softmax over the last axis FIRST, then * 1/sqrt(F) (matches the PyTorch
    # module, which does NOT scale the logits).  Softmax math stays f32.
    s_max = jnp.max(s, axis=-1, keepdims=True)
    e = jnp.exp(s - s_max)
    denom = jnp.sum(e, axis=-1, keepdims=True)
    if approx_recip:
        att = e * (inv_scale * pl.reciprocal(denom, approx=True))  # EUP slot
    else:
        att = e * (inv_scale / denom)                              # exact (validation)

    # ---- att @ V for all (batch, head) pairs in ONE batched dot_general.
    oh = mxu(att, v, (((2,), (1,)), ((0,), (0,))))                 # (Bblk*H,n,d)

    # ---- reassemble 'b h n d -> (b n)(h d)' ONCE, then ONE (rows,F)@(F,F)
    #      output projection (single MXU push + single bias add).
    o2 = jnp.concatenate(
        [jnp.concatenate([oh[b * H + h] for h in range(H)], axis=-1)   # (n, F)
         for b in range(Bblk)],
        axis=0)                                                         # (rows, F)

    y = mxu(o2, wp_ref[...], (((1,), (0,)), ((), ()))) + bp_ref[...]
    o_ref[...] = y.astype(o_ref.dtype)


def multihead_attention(x, params, *, num_heads, batch_blocks=1,
                        mxu_dtype=jnp.float32, approx_recip=True):
    """x: (b, n, F). params: PyTorch-convention weights (out, in), biases (F,).

    batch_blocks: 1 (default) = single grid step, best on 1-TC v5e/v6e.
                  2 on v7x shards the batch across its 2 TensorCores.
    mxu_dtype:    jnp.float32 (default, exact parity / v5e) or jnp.bfloat16
                  (v6e/v7x MXU fast path; softmax & accumulation stay f32).
    approx_recip: EUP approximate reciprocal in the softmax denominator;
                  set False for strict validation builds.
    """
    b, n, F = x.shape
    assert F % num_heads == 0
    assert b % batch_blocks == 0

    # Wrapper glue: fuse Q/K/V weights along the output axis, pre-transpose to
    # (in, out), flatten batch into rows so all kernel refs are 2-D.
    wqkv = jnp.concatenate([params["wq"].T, params["wk"].T, params["wv"].T],
                           axis=1).astype(mxu_dtype)                 # (F, 3F)
    bqkv = jnp.concatenate([params["bq"], params["bk"], params["bv"]]
                           ).reshape(1, 3 * F).astype(jnp.float32)
    wp = params["wp"].T.astype(mxu_dtype)                            # (F, F)
    bp = params["bp"].reshape(1, F).astype(jnp.float32)
    x2d = x.reshape(b * n, F).astype(mxu_dtype)

    rows_per_step = (b // batch_blocks) * n
    kernel = functools.partial(_mha_kernel, num_heads=num_heads, seq_len=n,
                               mxu_dtype=mxu_dtype, approx_recip=approx_recip)

    out2d = pl.pallas_call(
        kernel,
        out_shape=jax.ShapeDtypeStruct((b * n, F), x.dtype),
        grid_spec=pltpu.PrefetchScalarGridSpec(
            num_scalar_prefetch=0,
            grid=(batch_blocks,),
            in_specs=[
                pl.BlockSpec((rows_per_step, F), lambda i: (i, 0)),   # x rows
                pl.BlockSpec((F, 3 * F), lambda i: (0, 0)),           # [Wq|Wk|Wv]^T
                pl.BlockSpec((1, 3 * F), lambda i: (0, 0)),           # fused QKV bias
                pl.BlockSpec((F, F), lambda i: (0, 0)),               # Wp^T
                pl.BlockSpec((1, F), lambda i: (0, 0)),               # bp
            ],
            out_specs=pl.BlockSpec((rows_per_step, F), lambda i: (i, 0)),
        ),
        compiler_params=pltpu.CompilerParams(
            # One step by default; with batch_blocks=2 this shards the batch
            # across v7x's 2 TensorCores (measured ~0 effect on 1-TC chips).
            dimension_semantics=("parallel",)),
    )(x2d, wqkv, bqkv, wp, bp)

    return out2d.reshape(b, n, F)


def _init_linear(key, fan_in, fan_out):
    """PyTorch nn.Linear default init: U(-1/sqrt(fan_in), 1/sqrt(fan_in))."""
    kw, kb = jax.random.split(key)
    bound = 1.0 / math.sqrt(fan_in)
    w = jax.random.uniform(kw, (fan_out, fan_in), jnp.float32, -bound, bound)
    b = jax.random.uniform(kb, (fan_out,), jnp.float32, -bound, bound)
    return w, b


def _reference(x, params, num_heads):
    """Pure-JAX reference of the PyTorch forward (eval mode)."""
    b, n, F = x.shape
    d = F // num_heads

    def lin(t, w, bb):
        return jnp.einsum("bnf,gf->bng", t, w) + bb

    def to_heads(t):
        return t.reshape(b, n, num_heads, d).transpose(0, 2, 1, 3)

    q = to_heads(lin(x, params["wq"], params["bq"]))
    k = to_heads(lin(x, params["wk"], params["bk"]))
    v = to_heads(lin(x, params["wv"], params["bv"]))
    scores = jnp.einsum("bhqd,bhkd->bhqk", q, k)
    att = jax.nn.softmax(scores, axis=-1) / math.sqrt(F)
    out = jnp.einsum("bhal,bhlv->bhav", att, v)
    out = out.transpose(0, 2, 1, 3).reshape(b, n, F)
    return lin(out, params["wp"], params["bp"])


if __name__ == "__main__":
    attention_num = 4     # heads
    feature_dim = 32
    batch = 2
    seq = 8

    key = jax.random.PRNGKey(0)
    kx, kq, kk, kv, kp = jax.random.split(key, 5)

    x = jax.random.normal(kx, (batch, seq, feature_dim), jnp.float32)

    wq, bq = _init_linear(kq, feature_dim, feature_dim)
    wk, bk = _init_linear(kk, feature_dim, feature_dim)
    wv, bv = _init_linear(kv, feature_dim, feature_dim)
    wp, bp = _init_linear(kp, feature_dim, feature_dim)
    params = dict(wq=wq, bq=bq, wk=wk, bk=bk, wv=wv, bv=bv, wp=wp, bp=bp)

    ref = _reference(x, params, attention_num)

    # 1) Default config: collapsed grid (v5e/v6e), f32 MXU feed, EUP recip.
    out = multihead_attention(x, params, num_heads=attention_num)
    out = jax.block_until_ready(out)
    assert out.shape == (batch, seq, feature_dim)
    # Tolerance covers the ~1e-4 relative error of the approx reciprocal.
    assert jnp.allclose(out, ref, atol=2e-3, rtol=2e-3), "mismatch (default)"

    # 2) Validation build: exact reciprocal.
    out_exact = jax.block_until_ready(
        multihead_attention(x, params, num_heads=attention_num,
                            approx_recip=False))
    assert jnp.allclose(out_exact, ref, atol=2e-3, rtol=2e-3), "mismatch (exact)"

    # 3) v7x-style config: batch sharded across 2 cores (serial 2-step loop on
    #    1-TC chips, still correct).
    out_v7x = jax.block_until_ready(
        multihead_attention(x, params, num_heads=attention_num, batch_blocks=2))
    assert jnp.allclose(out_v7x, ref, atol=2e-3, rtol=2e-3), "mismatch (2 blocks)"

    # 4) v6e/v7x MXU fast path: bf16 operands, f32 softmax/accumulation.
    out_bf16 = jax.block_until_ready(
        multihead_attention(x, params, num_heads=attention_num,
                            mxu_dtype=jnp.bfloat16))
    assert jnp.allclose(out_bf16, ref, atol=1e-1, rtol=1e-1), "mismatch (bf16)"

    print("KERNEL_OK")
</pallas_src>

<mosaic_0001>
module attributes {stable_mosaic.version = 11 : i64} {
  func.func @_mha_kernel(%arg0: i32, %arg1: memref<16x32xf32, #tpu.memory_space<vmem>>, %arg2: memref<32x96xf32, #tpu.memory_space<vmem>>, %arg3: memref<1x96xf32, #tpu.memory_space<vmem>>, %arg4: memref<32x32xf32, #tpu.memory_space<vmem>>, %arg5: memref<1x32xf32, #tpu.memory_space<vmem>>, %arg6: memref<16x32xf32, #tpu.memory_space<vmem>>) attributes {dimension_semantics = [#tpu.dimension_semantics<parallel>], iteration_bounds = array<i64: 1>, scalar_prefetch = 0 : i64, scratch_operands = 0 : i64, tpu.core_type = #tpu.core_type<tc>, window_params = [{transform_indices = @transform_0, window_bounds = array<i64: 16, 32>}, {pipeline_mode = #tpu.pipeline_mode<synchronous>, transform_indices = @transform_1, window_bounds = array<i64: 32, 96>}, {pipeline_mode = #tpu.pipeline_mode<synchronous>, transform_indices = @transform_2, window_bounds = array<i64: 1, 96>}, {pipeline_mode = #tpu.pipeline_mode<synchronous>, transform_indices = @transform_3, window_bounds = array<i64: 32, 32>}, {pipeline_mode = #tpu.pipeline_mode<synchronous>, transform_indices = @transform_4, window_bounds = array<i64: 1, 32>}, {transform_indices = @transform_5, window_bounds = array<i64: 16, 32>}]} {
    %c0 = arith.constant 0 : index
    %c0_0 = arith.constant 0 : index
    %0 = vector.load %arg1[%c0, %c0_0] : memref<16x32xf32, #tpu.memory_space<vmem>>, vector<16x32xf32>
    %c0_1 = arith.constant 0 : index
    %c0_2 = arith.constant 0 : index
    %1 = vector.load %arg2[%c0_1, %c0_2] : memref<32x96xf32, #tpu.memory_space<vmem>>, vector<32x96xf32>
    %cst = arith.constant dense<0.000000e+00> : vector<16x96xf32>
    %2 = tpu.matmul %0, %1, %cst {dimension_numbers = #tpu.dot_dimension_numbers<[1], [0], [0], [1], [0, 0, 1, 1], [], []>} : vector<16x32xf32>, vector<32x96xf32>, vector<16x96xf32> -> vector<16x96xf32>
    %c0_3 = arith.constant 0 : index
    %c0_4 = arith.constant 0 : index
    %3 = vector.load %arg3[%c0_3, %c0_4] : memref<1x96xf32, #tpu.memory_space<vmem>>, vector<1x96xf32>
    %4 = vector.broadcast %3 : vector<1x96xf32> to vector<16x96xf32>
    %5 = arith.addf %2, %4 : vector<16x96xf32>
    %6 = vector.extract_strided_slice %5 {offsets = [0, 0], sizes = [8, 8], strides = [1, 1]} : vector<16x96xf32> to vector<8x8xf32>
    %7 = vector.extract_strided_slice %5 {offsets = [0, 8], sizes = [8, 8], strides = [1, 1]} : vector<16x96xf32> to vector<8x8xf32>
    %8 = vector.extract_strided_slice %5 {offsets = [0, 16], sizes = [8, 8], strides = [1, 1]} : vector<16x96xf32> to vector<8x8xf32>
    %9 = vector.extract_strided_slice %5 {offsets = [0, 24], sizes = [8, 8], strides = [1, 1]} : vector<16x96xf32> to vector<8x8xf32>
    %10 = vector.extract_strided_slice %5 {offsets = [8, 0], sizes = [8, 8], strides = [1, 1]} : vector<16x96xf32> to vector<8x8xf32>
    %11 = vector.extract_strided_slice %5 {offsets = [8, 8], sizes = [8, 8], strides = [1, 1]} : vector<16x96xf32> to vector<8x8xf32>
    %12 = vector.extract_strided_slice %5 {offsets = [8, 16], sizes = [8, 8], strides = [1, 1]} : vector<16x96xf32> to vector<8x8xf32>
    %13 = vector.extract_strided_slice %5 {offsets = [8, 24], sizes = [8, 8], strides = [1, 1]} : vector<16x96xf32> to vector<8x8xf32>
    %14 = vector.shape_cast %6 : vector<8x8xf32> to vector<1x8x8xf32>
    %15 = vector.shape_cast %7 : vector<8x8xf32> to vector<1x8x8xf32>
    %16 = vector.shape_cast %8 : vector<8x8xf32> to vector<1x8x8xf32>
    %17 = vector.shape_cast %9 : vector<8x8xf32> to vector<1x8x8xf32>
    %18 = vector.shape_cast %10 : vector<8x8xf32> to vector<1x8x8xf32>
    %19 = vector.shape_cast %11 : vector<8x8xf32> to vector<1x8x8xf32>
    %20 = vector.shape_cast %12 : vector<8x8xf32> to vector<1x8x8xf32>
    %21 = vector.shape_cast %13 : vector<8x8xf32> to vector<1x8x8xf32>
    %22 = tpu.concatenate %14, %15, %16, %17, %18, %19, %20, %21 in 0 : vector<1x8x8xf32>, vector<1x8x8xf32>, vector<1x8x8xf32>, vector<1x8x8xf32>, vector<1x8x8xf32>, vector<1x8x8xf32>, vector<1x8x8xf32>, vector<1x8x8xf32> -> vector<8x8x8xf32>
    %23 = vector.extract_strided_slice %5 {offsets = [0, 32], sizes = [8, 8], strides = [1, 1]} : vector<16x96xf32> to vector<8x8xf32>
    %24 = vector.extract_strided_slice %5 {offsets = [0, 40], sizes = [8, 8], strides = [1, 1]} : vector<16x96xf32> to vector<8x8xf32>
    %25 = vector.extract_strided_slice %5 {offsets = [0, 48], sizes = [8, 8], strides = [1, 1]} : vector<16x96xf32> to vector<8x8xf32>
    %26 = vector.extract_strided_slice %5 {offsets = [0, 56], sizes = [8, 8], strides = [1, 1]} : vector<16x96xf32> to vector<8x8xf32>
    %27 = vector.extract_strided_slice %5 {offsets = [8, 32], sizes = [8, 8], strides = [1, 1]} : vector<16x96xf32> to vector<8x8xf32>
    %28 = vector.extract_strided_slice %5 {offsets = [8, 40], sizes = [8, 8], strides = [1, 1]} : vector<16x96xf32> to vector<8x8xf32>
    %29 = vector.extract_strided_slice %5 {offsets = [8, 48], sizes = [8, 8], strides = [1, 1]} : vector<16x96xf32> to vector<8x8xf32>
    %30 = vector.extract_strided_slice %5 {offsets = [8, 56], sizes = [8, 8], strides = [1, 1]} : vector<16x96xf32> to vector<8x8xf32>
    %31 = vector.shape_cast %23 : vector<8x8xf32> to vector<1x8x8xf32>
    %32 = vector.shape_cast %24 : vector<8x8xf32> to vector<1x8x8xf32>
    %33 = vector.shape_cast %25 : vector<8x8xf32> to vector<1x8x8xf32>
    %34 = vector.shape_cast %26 : vector<8x8xf32> to vector<1x8x8xf32>
    %35 = vector.shape_cast %27 : vector<8x8xf32> to vector<1x8x8xf32>
    %36 = vector.shape_cast %28 : vector<8x8xf32> to vector<1x8x8xf32>
    %37 = vector.shape_cast %29 : vector<8x8xf32> to vector<1x8x8xf32>
    %38 = vector.shape_cast %30 : vector<8x8xf32> to vector<1x8x8xf32>
    %39 = tpu.concatenate %31, %32, %33, %34, %35, %36, %37, %38 in 0 : vector<1x8x8xf32>, vector<1x8x8xf32>, vector<1x8x8xf32>, vector<1x8x8xf32>, vector<1x8x8xf32>, vector<1x8x8xf32>, vector<1x8x8xf32>, vector<1x8x8xf32> -> vector<8x8x8xf32>
    %40 = vector.extract_strided_slice %5 {offsets = [0, 64], sizes = [8, 8], strides = [1, 1]} : vector<16x96xf32> to vector<8x8xf32>
    %41 = vector.extract_strided_slice %5 {offsets = [0, 72], sizes = [8, 8], strides = [1, 1]} : vector<16x96xf32> to vector<8x8xf32>
    %42 = vector.extract_strided_slice %5 {offsets = [0, 80], sizes = [8, 8], strides = [1, 1]} : vector<16x96xf32> to vector<8x8xf32>
    %43 = vector.extract_strided_slice %5 {offsets = [0, 88], sizes = [8, 8], strides = [1, 1]} : vector<16x96xf32> to vector<8x8xf32>
    %44 = vector.extract_strided_slice %5 {offsets = [8, 64], sizes = [8, 8], strides = [1, 1]} : vector<16x96xf32> to vector<8x8xf32>
    %45 = vector.extract_strided_slice %5 {offsets = [8, 72], sizes = [8, 8], strides = [1, 1]} : vector<16x96xf32> to vector<8x8xf32>
    %46 = vector.extract_strided_slice %5 {offsets = [8, 80], sizes = [8, 8], strides = [1, 1]} : vector<16x96xf32> to vector<8x8xf32>
    %47 = vector.extract_strided_slice %5 {offsets = [8, 88], sizes = [8, 8], strides = [1, 1]} : vector<16x96xf32> to vector<8x8xf32>
    %48 = vector.shape_cast %40 : vector<8x8xf32> to vector<1x8x8xf32>
    %49 = vector.shape_cast %41 : vector<8x8xf32> to vector<1x8x8xf32>
    %50 = vector.shape_cast %42 : vector<8x8xf32> to vector<1x8x8xf32>
    %51 = vector.shape_cast %43 : vector<8x8xf32> to vector<1x8x8xf32>
    %52 = vector.shape_cast %44 : vector<8x8xf32> to vector<1x8x8xf32>
    %53 = vector.shape_cast %45 : vector<8x8xf32> to vector<1x8x8xf32>
    %54 = vector.shape_cast %46 : vector<8x8xf32> to vector<1x8x8xf32>
    %55 = vector.shape_cast %47 : vector<8x8xf32> to vector<1x8x8xf32>
    %56 = tpu.concatenate %48, %49, %50, %51, %52, %53, %54, %55 in 0 : vector<1x8x8xf32>, vector<1x8x8xf32>, vector<1x8x8xf32>, vector<1x8x8xf32>, vector<1x8x8xf32>, vector<1x8x8xf32>, vector<1x8x8xf32>, vector<1x8x8xf32> -> vector<8x8x8xf32>
    %cst_5 = arith.constant dense<0.000000e+00> : vector<8x8x8xf32>
    %57 = tpu.matmul %22, %39, %cst_5 {dimension_numbers = #tpu.dot_dimension_numbers<[2], [2], [1], [1], [0, 0, 0, 1, 1, 1], [0], [0]>} : vector<8x8x8xf32>, vector<8x8x8xf32>, vector<8x8x8xf32> -> vector<8x8x8xf32>
    %cst_6 = arith.constant dense<0xFF800000> : vector<8x8xf32>
    %58 = vector.multi_reduction <maximumf>, %57, %cst_6 [2] : vector<8x8x8xf32> to vector<8x8xf32>
    %59 = vector.shape_cast %58 : vector<8x8xf32> to vector<8x8x1xf32>
    %60 = vector.broadcast %59 : vector<8x8x1xf32> to vector<8x8x8xf32>
    %61 = arith.subf %57, %60 : vector<8x8x8xf32>
    %62 = math.exp %61 : vector<8x8x8xf32>
    %cst_7 = arith.constant dense<0.000000e+00> : vector<8x8xf32>
    %63 = vector.multi_reduction <add>, %62, %cst_7 [2] : vector<8x8x8xf32> to vector<8x8xf32>
    %64 = vector.shape_cast %63 : vector<8x8xf32> to vector<8x8x1xf32>
    %65 = tpu.reciprocal %64 {approx = true} : vector<8x8x1xf32> -> vector<8x8x1xf32>
    %cst_8 = arith.constant 0.176776692 : f32
    %66 = vector.broadcast %cst_8 : f32 to vector<8x8x1xf32>
    %67 = arith.mulf %66, %65 : vector<8x8x1xf32>
    %68 = vector.broadcast %67 : vector<8x8x1xf32> to vector<8x8x8xf32>
    %69 = arith.mulf %62, %68 : vector<8x8x8xf32>
    %cst_9 = arith.constant dense<0.000000e+00> : vector<8x8x8xf32>
    %70 = tpu.matmul %69, %56, %cst_9 {dimension_numbers = #tpu.dot_dimension_numbers<[2], [1], [1], [2], [0, 0, 0, 1, 1, 2], [0], [0]>} : vector<8x8x8xf32>, vector<8x8x8xf32>, vector<8x8x8xf32> -> vector<8x8x8xf32>
    %71 = vector.extract_strided_slice %70 {offsets = [0, 0, 0], sizes = [1, 8, 8], strides = [1, 1, 1]} : vector<8x8x8xf32> to vector<1x8x8xf32>
    %72 = vector.shape_cast %71 : vector<1x8x8xf32> to vector<8x8xf32>
    %73 = vector.extract_strided_slice %70 {offsets = [1, 0, 0], sizes = [1, 8, 8], strides = [1, 1, 1]} : vector<8x8x8xf32> to vector<1x8x8xf32>
    %74 = vector.shape_cast %73 : vector<1x8x8xf32> to vector<8x8xf32>
    %75 = vector.extract_strided_slice %70 {offsets = [2, 0, 0], sizes = [1, 8, 8], strides = [1, 1, 1]} : vector<8x8x8xf32> to vector<1x8x8xf32>
    %76 = vector.shape_cast %75 : vector<1x8x8xf32> to vector<8x8xf32>
    %77 = vector.extract_strided_slice %70 {offsets = [3, 0, 0], sizes = [1, 8, 8], strides = [1, 1, 1]} : vector<8x8x8xf32> to vector<1x8x8xf32>
    %78 = vector.shape_cast %77 : vector<1x8x8xf32> to vector<8x8xf32>
    %79 = tpu.concatenate %72, %74, %76, %78 in 1 : vector<8x8xf32>, vector<8x8xf32>, vector<8x8xf32>, vector<8x8xf32> -> vector<8x32xf32>
    %80 = vector.extract_strided_slice %70 {offsets = [4, 0, 0], sizes = [1, 8, 8], strides = [1, 1, 1]} : vector<8x8x8xf32> to vector<1x8x8xf32>
    %81 = vector.shape_cast %80 : vector<1x8x8xf32> to vector<8x8xf32>
    %82 = vector.extract_strided_slice %70 {offsets = [5, 0, 0], sizes = [1, 8, 8], strides = [1, 1, 1]} : vector<8x8x8xf32> to vector<1x8x8xf32>
    %83 = vector.shape_cast %82 : vector<1x8x8xf32> to vector<8x8xf32>
    %84 = vector.extract_strided_slice %70 {offsets = [6, 0, 0], sizes = [1, 8, 8], strides = [1, 1, 1]} : vector<8x8x8xf32> to vector<1x8x8xf32>
    %85 = vector.shape_cast %84 : vector<1x8x8xf32> to vector<8x8xf32>
    %86 = vector.extract_strided_slice %70 {offsets = [7, 0, 0], sizes = [1, 8, 8], strides = [1, 1, 1]} : vector<8x8x8xf32> to vector<1x8x8xf32>
    %87 = vector.shape_cast %86 : vector<1x8x8xf32> to vector<8x8xf32>
    %88 = tpu.concatenate %81, %83, %85, %87 in 1 : vector<8x8xf32>, vector<8x8xf32>, vector<8x8xf32>, vector<8x8xf32> -> vector<8x32xf32>
    %89 = tpu.concatenate %79, %88 in 0 : vector<8x32xf32>, vector<8x32xf32> -> vector<16x32xf32>
    %c0_10 = arith.constant 0 : index
    %c0_11 = arith.constant 0 : index
    %90 = vector.load %arg4[%c0_10, %c0_11] : memref<32x32xf32, #tpu.memory_space<vmem>>, vector<32x32xf32>
    %cst_12 = arith.constant dense<0.000000e+00> : vector<16x32xf32>
    %91 = tpu.matmul %89, %90, %cst_12 {dimension_numbers = #tpu.dot_dimension_numbers<[1], [0], [0], [1], [0, 0, 1, 1], [], []>} : vector<16x32xf32>, vector<32x32xf32>, vector<16x32xf32> -> vector<16x32xf32>
    %c0_13 = arith.constant 0 : index
    %c0_14 = arith.constant 0 : index
    %92 = vector.load %arg5[%c0_13, %c0_14] : memref<1x32xf32, #tpu.memory_space<vmem>>, vector<1x32xf32>
    %93 = vector.broadcast %92 : vector<1x32xf32> to vector<16x32xf32>
    %94 = arith.addf %91, %93 : vector<16x32xf32>
    %c0_15 = arith.constant 0 : index
    %c0_16 = arith.constant 0 : index
    %95 = vector.load %arg6[%c0_15, %c0_16] : memref<16x32xf32, #tpu.memory_space<vmem>>, vector<16x32xf32>
    tpu.vector_store %arg6[%c0_15, %c0_16], %94 {strides = array<i32>} : memref<16x32xf32, #tpu.memory_space<vmem>>, vector<16x32xf32>,
    return
  }
  func.func @transform_0(%arg0: i32) -> (i32, i32) {
    %c0_i32 = arith.constant 0 : i32
    %c0_i32_0 = arith.constant 0 : i32
    return %arg0, %c0_i32 : i32, i32
  }
  func.func @transform_1(%arg0: i32) -> (i32, i32) {
    %c0_i32 = arith.constant 0 : i32
    %c0_i32_0 = arith.constant 0 : i32
    %c0_i32_1 = arith.constant 0 : i32
    return %c0_i32, %c0_i32_0 : i32, i32
  }
  func.func @transform_2(%arg0: i32) -> (i32, i32) {
    %c0_i32 = arith.constant 0 : i32
    %c0_i32_0 = arith.constant 0 : i32
    %c0_i32_1 = arith.constant 0 : i32
    return %c0_i32, %c0_i32_0 : i32, i32
  }
  func.func @transform_3(%arg0: i32) -> (i32, i32) {
    %c0_i32 = arith.constant 0 : i32
    %c0_i32_0 = arith.constant 0 : i32
    %c0_i32_1 = arith.constant 0 : i32
    return %c0_i32, %c0_i32_0 : i32, i32
  }
  func.func @transform_4(%arg0: i32) -> (i32, i32) {
    %c0_i32 = arith.constant 0 : i32
    %c0_i32_0 = arith.constant 0 : i32
    %c0_i32_1 = arith.constant 0 : i32
    return %c0_i32, %c0_i32_0 : i32, i32
  }
  func.func @transform_5(%arg0: i32) -> (i32, i32) {
    %c0_i32 = arith.constant 0 : i32
    %c0_i32_0 = arith.constant 0 : i32
    return %arg0, %c0_i32 : i32, i32
  }
}

</mosaic_0001>

<bundles_post_ra>
// kernel: tpu_custom_call.1
= control target key start
LH: loop header
LB: loop body
LE: loop exit
PB: predicated region body
PF: predicated region fallthrough
CT: control target
= control target key end

     0   :  { %10 = vsyncpa [#allocation3], 0  ;;  %s2247_s0 = inlined_call_operand.hbm [shape: f32[16,32], index: 0, kind: input, shape index: {}]   ;;  %s2248_s1 = inlined_call_operand.hbm [shape: f32[32,96], index: 1, kind: input, shape index: {}]   ;;  %s2249_s2 = inlined_call_operand.vmem [shape: f32[1,96], index: 2, kind: input, shape index: {}]   ;;  %s2250_s3 = inlined_call_operand.hbm [shape: f32[32,32], index: 3, kind: input, shape index: {}]   ;;  %s2251_s4 = inlined_call_operand.vmem [shape: f32[1,32], index: 4, kind: input, shape index: {}]   ;;  %s2252_s5 = inlined_call_operand.hbm [shape: f32[16,32], index: 5, kind: output, shape index: {}]  }
   0x1   :  { %11 = vsyncpa [#allocation6], 0 }
   0x2   :  { %12 = vsyncpa [#allocation4], 0  ;;  %s1961_s18 = smov [#allocation5]   ;;  %s1962_s20 = smov [#allocation2]  }
   0x3   :  { %s30_s19 = sshll.u32 %s1961_s18, 4  ;;  %s18_s21 = sshll.u32 %s1962_s20, 4  ;;  %s31_s19 = int_to_ptr.vmem [resolvable:$true] %s30_s19  ;;  %s2006_s21 = int_to_ptr.vmem [resolvable:$true] %s18_s21 }
   0x4   :  { %s1867_s24 = scalar_lea.hbm %s2248_s1, 512 }
   0x5   :  { %p1868_p0 = scmp.ne.s32.totalorder %s2248_s1, %s1867_s24  ;;  %p1871_p1 = scmp.lt.u32.totalorder %s1867_s24, %s2248_s1 }
   0x7   :  { %p1873_p2 = pnand %p1871_p1, %p1868_p0 }
   0x9   :  { %1876 = shalt.err (!%p1873_p2)
}
   0xa   :  { %s1877_s29 = scalar_lea.vmem %s31_s19, 512  ;;  %p1882_p4 = scmp.lt.s32.totalorder %s31_s19, %s31_s19 }
   0xb   :  { %p1878_p3 = scmp.ne.s32.totalorder %s31_s19, %s1877_s29  ;;  %p1883_p5 = scmp.lt.s32.totalorder %s1877_s29, %s1877_s29 }
   0xd   :  { %p1884_p6 = por %p1883_p5, %p1882_p4 }
   0xf   :  { %p1885_p7 = pnand %p1884_p6, %p1878_p3 }
  0x11   :  { %1888 = shalt.err (!%p1885_p7)
}
  0x12   :  { %s1963_s30 = smov 128   ;;  %s1964_s6 = smov 8  }
  0x13   :  { %36 = dma.hbm_to_vmem [thread:$0]  %s2248_s1, 512, %s31_s19, [#allocation6], %s1963_s30, %s1963_s30, %s1964_s6  }
  0x14   :  { %s1889_s11 = scalar_lea.hbm %s2247_s0, 256 }
  0x15   :  { %p1890_p8 = scmp.ne.s32.totalorder %s2247_s0, %s1889_s11  ;;  %p1893_p9 = scmp.lt.u32.totalorder %s1889_s11, %s2247_s0 }
  0x17   :  { %p1895_p10 = pnand %p1893_p9, %p1890_p8 }
  0x19   :  { %1898 = shalt.err (!%p1895_p10)
}
  0x1a   :  { %s1899_s16 = scalar_lea.vmem %s2006_s21, 256  ;;  %p1904_p12 = scmp.lt.s32.totalorder %s2006_s21, %s2006_s21 }
  0x1b   :  { %p1900_p11 = scmp.ne.s32.totalorder %s2006_s21, %s1899_s16  ;;  %p1905_p13 = scmp.lt.s32.totalorder %s1899_s16, %s1899_s16 }
  0x1d   :  { %p1906_p0 = por %p1905_p13, %p1904_p12 }
  0x1f   :  { %p1907_p1 = pnand %p1906_p0, %p1900_p11 }
  0x21   :  { %1910 = shalt.err (!%p1907_p1)
}
  0x22   :  { %24 = dma.hbm_to_vmem [thread:$0]  %s2247_s0, 256, %s2006_s21, [#allocation3], %s1963_s30, %s1963_s30, %s1964_s6  }
  0x23   :  { %s1965_s18 = smov [#allocation7]   ;;  %s1911_s23 = scalar_lea.hbm %s2250_s3, 512 }
  0x24   :  { %s44_s19 = sshll.u32 %s1965_s18, 4  ;;  %p1912_p2 = scmp.ne.s32.totalorder %s2250_s3, %s1911_s23  ;;  %s45_s19 = int_to_ptr.vmem [resolvable:$true] %s44_s19 }
  0x25   :  { %p1915_p3 = scmp.lt.u32.totalorder %s1911_s23, %s2250_s3 }
  0x27   :  { %p1917_p4 = pnand %p1915_p3, %p1912_p2 }
  0x29   :  { %1920 = shalt.err (!%p1917_p4)
}
  0x2a   :  { %s1921_s28 = scalar_lea.vmem %s45_s19, 512  ;;  %p1926_p6 = scmp.lt.s32.totalorder %s45_s19, %s45_s19 }
  0x2b   :  { %p1922_p5 = scmp.ne.s32.totalorder %s45_s19, %s1921_s28  ;;  %p1927_p7 = scmp.lt.s32.totalorder %s1921_s28, %s1921_s28 }
  0x2d   :  { %p1928_p8 = por %p1927_p7, %p1926_p6 }
  0x2f   :  { %p1929_p9 = pnand %p1928_p8, %p1922_p5 }
  0x31   :  { %1932 = shalt.err (!%p1929_p9)
}
  0x32   :  { %50 = dma.hbm_to_vmem [thread:$0]  %s2250_s3, 512, %s45_s19, [#allocation6], %s1963_s30, %s1963_s30, %s1964_s6  }
  0x33   :  { %1955 = dma.done.wait [#allocation3], 256  }
  0x34   :  { %1956 = vsyncadd [#allocation3], 4294967040 }
  0x35   :  { %1957 = dma.done.wait [#allocation6], 1024  }
  0x36   :  { %1958 = vsyncadd [#allocation6], 4294966272  ;;  %vm75_vm0 = vcmask 261120   ;;  %v64_v0 = vld [vmem:[#allocation5] sm:$0xff]  ;;  %v65_v1 = vld [vmem:[#allocation5 + $0x8] sm:$0xff]  ;;  %v1966_v10 = vmov 0.0  }
  0x37   :  { %v66_v2 = vld [vmem:[#allocation5 + $0x10] sm:$0xff]  ;;  %v1804_v3 = vpack.c.bf16 %v65_v1, %v64_v0  ;;  %v67_v4 = vld [vmem:[#allocation5 + $0x18] sm:$0xff]  ;;  %1713 = vmatprep.subr.mxu1 %v1966_v10  ;;  %s1967_s7 = smov 104   ;;  %s1968_s8 = smov 120   ;;  %vm1969_vm1 = vmmov 0   ;;  %vm173_vm2 = vcmask 64512  }
  0x38   :  { %v62_v5 = vld [vmem:[#allocation2] sm:$0xff]  ;;  %v1808_v6 = vpack.c.bf16 %v67_v4, %v66_v2  ;;  %v63_v7 = vld [vmem:[#allocation2 + $0x8] sm:$0xff]  ;;  %1715 = vmatprep.mubr.msk.f32.mxu1 %vm1969_vm1, %v1966_v10  ;;  %s1971_s9 = smov 96   ;;  %s1972_s10 = smov 64   ;;  %vm1497_vm3 = vcmask 130048   ;;  %vm1499_vm4 = vcmask 195584  }
  0x39   :  { %1710 = vmatprep.mubr.msk.f32.mxu0 %vm75_vm0, %v62_v5  ;;  %1805 = vmatprep.subr.bf16.mxu0 %v1804_v3  ;;  %v1628_v8 = vld [vmem:[%s2249_s2] ss:$0 sm:$0xff]  ;;  %s1970_s2 = smov 112   ;;  %s1973_s11 = smov 16  }
  0x3a   :  { %1807 = vmatpush3.bf16.msra.mxu0 %v1804_v3  ;;  %s1974_s12 = smov 24   ;;  %s1975_s15 = smov [#allocation8]  }
  0x3b   :  { %1809 = vmatprep.subr.bf16.mxu0 %v1808_v6  ;;  %s1615_s16 = sshll.u32 %s1975_s15, 4  ;;  %s1616_s16 = int_to_ptr.vmem [resolvable:$true] %s1615_s16 }
  0x3c   :  { %s1933_s1 = scalar_lea.vmem %s1616_s16, 256  ;;  %p1938_p11 = scmp.lt.s32.totalorder %s1616_s16, %s1616_s16 }
  0x3d   :  { %p1934_p10 = scmp.ne.s32.totalorder %s1616_s16, %s1933_s1  ;;  %p1939_p12 = scmp.lt.s32.totalorder %s1933_s1, %s1933_s1 }
  0x3e   :  { %1811 = vmatpush3.bf16.msra.mxu0 %v1808_v6 }
  0x3f   :  { %1733 = vmatprep.subr.mxu0 %v1966_v10  ;;  %p1940_p13 = por %p1939_p12, %p1938_p11 }
  0x41   :  { %1711 = vmatmul.mubr.msk.f32.vlgmr.msra.gmra.mrb[0].mxu0 %vm75_vm0, %v63_v7  ;;  %p1941_p0 = pnand %p1940_p13, %p1934_p10 }
  0x42   :  { %1735 = vmatprep.mubr.msk.f32.mxu0 %vm1969_vm1, %v1966_v10 }
 0x114   :  { %v1712_v9 = vpop.f32.mrb[0].mxu0 }
 0x115   :  { %v148_v11 = vpop.f32.mrb[1].mxu0  ;;  %v2073_v13 = vadd.f32 %v1712_v9, %v1628_v8 }
 0x116   :  { %v2065_v12 = vadd.f32 %v1628_v8, %v148_v11 }
 0x118   :  { %162 = vrot.lane.b32.xlu1 %v2065_v12, %s1967_s7  ;;  %158 = vrot.lane.b32.xlu0 %v2065_v12, %s1968_s8 }
 0x11c   :  { %165 = vrot.lane.b32.xlu1 %v2073_v13, %s1968_s8  ;;  %160 = vrot.lane.b32.xlu0 %v2065_v12, %s1970_s2 }
 0x120   :  { %169 = vrot.lane.b32.xlu1 %v2073_v13, %s1967_s7  ;;  %167 = vrot.lane.b32.xlu0 %v2073_v13, %s1970_s2 }
 0x124   :  { %171 = vrot.lane.b32.xlu0 %v2065_v12, %s1971_s9 }
 0x18a   :  { %v2080_v14 = vpop.permute.xlu1 %162  ;;  %v2082_v15 = vpop.permute.xlu0 %158 }
 0x18b   :  { %248 = vrot.lane.b32.xlu1 %v2082_v15, %s1971_s9 }
 0x18e   :  { %v2085_v16 = vpop.permute.xlu0 %160  ;;  %v2089_v17 = vpop.permute.xlu1 %165 }
 0x18f   :  { %400 = vrot.lane.b32.xlu1 %v2080_v14, %s1971_s9  ;;  %324 = vrot.lane.b32.xlu0 %v2085_v16, %s1971_s9 }
 0x192   :  { %v2091_v18 = vpop.permute.xlu0 %167  ;;  %v2095_v19 = vpop.permute.xlu1 %169 }
 0x193   :  { %552 = vrot.lane.b32.xlu1 %v2089_v17, %s1971_s9  ;;  %476 = vrot.lane.b32.xlu0 %v2073_v13, %s1971_s9 }
 0x196   :  { %v172_v20 = vpop.permute.xlu0 %171 }
 0x197   :  { %704 = vrot.lane.b32.xlu1 %v2095_v19, %s1971_s9  ;;  %628 = vrot.lane.b32.xlu0 %v2091_v18, %s1971_s9 }
 0x198   :  { %1714 = vmatpush3.xpose.msk.msra.mxu1 %vm173_vm2, %v172_v20 }
 0x199   :  { %1718 = vmatprep.subr.mxu1 %v1966_v10 }
 0x19b   :  { %1716 = vmatmul.mubr.msk.f32.vlgmr.msra.gmra.mrb[0].mxu1 %vm173_vm2, %v2065_v12 }
 0x19c   :  { %1720 = vmatprep.mubr.msk.f32.mxu1 %vm1969_vm1, %v1966_v10 }
 0x1fd   :  { %v249_v21 = vpop.permute.xlu1 %248 }
 0x1fe   :  { %1719 = vmatpush3.xpose.msk.msra.mxu1 %vm173_vm2, %v249_v21 }
 0x1ff   :  { %1723 = vmatprep.subr.mxu1 %v1966_v10 }
 0x201   :  { %v401_v22 = vpop.permute.xlu1 %400  ;;  %1721 = vmatmul.mubr.msk.f32.vlgmr.msra.gmra.mrb[2].mxu1 %vm173_vm2, %v2082_v15  ;;  %v325_v23 = vpop.permute.xlu0 %324 }
 0x202   :  { %1724 = vmatpush3.xpose.msk.msra.mxu1 %vm173_vm2, %v325_v23  ;;  %1725 = vmatprep.mubr.msk.f32.mxu1 %vm1969_vm1, %v1966_v10 }
 0x203   :  { %1728 = vmatprep.subr.mxu1 %v1966_v10 }
 0x205   :  { %1726 = vmatmul.mubr.msk.f32.vlgmr.msra.gmra.mrb[4].mxu1 %vm173_vm2, %v2085_v16  ;;  %v477_v24 = vpop.permute.xlu0 %476  ;;  %v553_v25 = vpop.permute.xlu1 %552 }
 0x206   :  { %1729 = vmatpush3.xpose.msk.msra.mxu1 %vm173_vm2, %v401_v22  ;;  %1734 = vmatpush3.xpose.msk.msra.mxu0 %vm173_vm2, %v477_v24 }
 0x207   :  { %1730 = vmatprep.mubr.msk.f32.mxu1 %vm1969_vm1, %v1966_v10  ;;  %1738 = vmatprep.subr.mxu1 %v1966_v10 }
 0x208   :  { %1743 = vmatprep.subr.mxu0 %v1966_v10 }
 0x209   :  { %1731 = vmatmul.mubr.msk.f32.vlgmr.msra.gmra.mrb[6].mxu1 %vm173_vm2, %v2080_v14  ;;  %1736 = vmatmul.mubr.msk.f32.vlgmr.msra.gmra.mrb[2].mxu0 %vm173_vm2, %v2073_v13  ;;  %v629_v26 = vpop.permute.xlu0 %628  ;;  %v705_v27 = vpop.permute.xlu1 %704 }
 0x20a   :  { %1739 = vmatpush3.xpose.msk.msra.mxu1 %vm173_vm2, %v553_v25  ;;  %1744 = vmatpush3.xpose.msk.msra.mxu0 %vm173_vm2, %v629_v26 }
 0x20b   :  { %1740 = vmatprep.mubr.msk.f32.mxu1 %vm1969_vm1, %v1966_v10  ;;  %1745 = vmatprep.mubr.msk.f32.mxu0 %vm1969_vm1, %v1966_v10 }
 0x20c   :  { %1748 = vmatprep.subr.mxu1 %v1966_v10  ;;  %1753 = vmatprep.subr.mxu0 %v1966_v10 }
 0x20d   :  { %1741 = vmatmul.mubr.msk.f32.vlgmr.msra.gmra.mrb[8].mxu1 %vm173_vm2, %v2089_v17  ;;  %1746 = vmatmul.mubr.msk.f32.vlgmr.msra.gmra.mrb[4].mxu0 %vm173_vm2, %v2091_v18 }
 0x20e   :  { %1749 = vmatpush3.xpose.msk.msra.mxu1 %vm173_vm2, %v705_v27  ;;  %1750 = vmatprep.mubr.msk.f32.mxu1 %vm1969_vm1, %v1966_v10 }
 0x20f   :  { %1758 = vmatprep.subr.mxu1 %v1966_v10  ;;  %1755 = vmatprep.mubr.msk.f32.mxu0 %vm1969_vm1, %v1966_v10 }
 0x211   :  { %1751 = vmatmul.mubr.msk.f32.vlgmr.msra.gmra.mrb[10].mxu1 %vm173_vm2, %v2095_v19 }
 0x212   :  { %1760 = vmatprep.mubr.msk.f32.mxu1 %vm1969_vm1, %v1966_v10 }
 0x26e   :  { %v244_v28 = vpop.f32.mrb[0].mxu1 }
 0x26f   :  { %v1717_v29 = vpop.f32.mrb[1].mxu1  ;;  %v780_v30 = vsel %vm173_vm2, %v244_v28, -inf }
 0x270   :  { %781 = vmax.xlane.f32.xlu0 %v780_v30 }
 0x2d4   :  { %v320_v31 = vpop.f32.mrb[2].mxu1 }
 0x2d5   :  { %v1722_v32 = vpop.f32.mrb[3].mxu1  ;;  %v783_v33 = vsel %vm173_vm2, %v320_v31, -inf }
 0x2d6   :  { %784 = vmax.xlane.f32.xlu1 %v783_v33 }
 0x2d8   :  { %v2149_v34 = vpop.f32.mrb[4].mxu1 }
 0x2d9   :  { %v1727_v35 = vpop.f32.mrb[5].mxu1  ;;  %v786_v36 = vsel %vm173_vm2, %v2149_v34, -inf }
 0x2da   :  { %787 = vmax.xlane.f32.xlu0 %v786_v36 }
 0x2dc   :  { %v472_v37 = vpop.f32.mrb[6].mxu1  ;;  %v548_v38 = vpop.f32.mrb[2].mxu0 }
 0x2dd   :  { %v1732_v39 = vpop.f32.mrb[7].mxu1  ;;  %v1737_v40 = vpop.f32.mrb[3].mxu0  ;;  %v789_v41 = vsel %vm173_vm2, %v472_v37, -inf  ;;  %v792_v42 = vsel %vm173_vm2, %v548_v38, -inf }
 0x2de   :  { %790 = vmax.xlane.f32.xlu0 %v789_v41  ;;  %793 = vmax.xlane.f32.xlu1 %v792_v42 }
 0x2e0   :  { %v624_v43 = vpop.f32.mrb[8].mxu1  ;;  %v700_v44 = vpop.f32.mrb[4].mxu0 }
 0x2e1   :  { %v1742_v45 = vpop.f32.mrb[9].mxu1  ;;  %v1747_v46 = vpop.f32.mrb[5].mxu0  ;;  %v795_v47 = vsel %vm173_vm2, %v624_v43, -inf  ;;  %v798_v48 = vsel %vm173_vm2, %v700_v44, -inf }
 0x2e2   :  { %796 = vmax.xlane.f32.xlu0 %v795_v47  ;;  %799 = vmax.xlane.f32.xlu1 %v798_v48 }
 0x2e4   :  { %v776_v49 = vpop.f32.mrb[10].mxu1 }
 0x2e5   :  { %v1752_v50 = vpop.f32.mrb[11].mxu1  ;;  %v801_v51 = vsel %vm173_vm2, %v776_v49, -inf }
 0x2e6   :  { %802 = vmax.xlane.f32.xlu0 %v801_v51 }
 0x2f3   :  { %876 = vrot.lane.b32.xlu1 %v2065_v12, %s1972_s10 }
 0x2f7   :  { %1028 = vrot.lane.b32.xlu1 %v2085_v16, %s1972_s10 }
 0x2fb   :  { %1104 = vrot.lane.b32.xlu1 %v2080_v14, %s1972_s10 }
 0x2fc   :  { %952 = vrot.lane.b32.xlu0 %v2082_v15, %s1972_s10 }
 0x2fd   :  { %v782_v52 = vpop.xlane.xlu0 %781 }
 0x2fe   :  { %v804_v57 = vsub.f32 %v244_v28, %v782_v52 }
 0x300   :  { %1180 = vrot.lane.b32.xlu0 %v2073_v13, %s1972_s10  ;;  %v812_v62 = vmul.f32 1.442695, %v804_v57 }
 0x363   :  { %v785_v53 = vpop.xlane.xlu1 %784 }
 0x364   :  { %v805_v54 = vsub.f32 %v320_v31, %v785_v53 }
 0x366   :  { %v814_v55 = vmul.f32 1.442695, %v805_v54 }
 0x367   :  { %v788_v56 = vpop.xlane.xlu0 %787 }
 0x368   :  { %1835 = vpow2.f32 %v814_v55  ;;  %v806_v6 = vsub.f32 %v2149_v34, %v788_v56 }
 0x36a   :  { %v816_v14 = vmul.f32 1.442695, %v806_v6 }
 0x36b   :  { %v794_v58 = vpop.xlane.xlu1 %793  ;;  %v791_v59 = vpop.xlane.xlu0 %790 }
 0x36c   :  { %v808_v60 = vsub.f32 %v548_v38, %v794_v58  ;;  %v807_v61 = vsub.f32 %v472_v37, %v791_v59 }
 0x36e   :  { %v820_v63 = vmul.f32 1.442695, %v808_v60  ;;  %v818_v0 = vmul.f32 1.442695, %v807_v61 }
 0x36f   :  { %v800_v1 = vpop.xlane.xlu1 %799  ;;  %v797_v2 = vpop.xlane.xlu0 %796 }
 0x370   :  { %1837 = vpow2.f32 %v820_v63  ;;  %v810_v3 = vsub.f32 %v700_v44, %v800_v1  ;;  %v809_v4 = vsub.f32 %v624_v43, %v797_v2 }
 0x371   :  { %1839 = vpow2.f32 %v818_v0 }
 0x372   :  { %v1836_v5 = vpop.eup %1835  ;;  %1841 = vpow2.f32 %v812_v62  ;;  %v824_v7 = vmul.f32 1.442695, %v810_v3  ;;  %v822_v8 = vmul.f32 1.442695, %v809_v4 }
 0x373   :  { %v877_v9 = vpop.permute.xlu1 %876  ;;  %v803_v11 = vpop.xlane.xlu0 %802  ;;  %v831_v12 = vsel %vm173_vm2, %v1836_v5, 0.0 }
 0x374   :  { %v811_v13 = vsub.f32 %v776_v49, %v803_v11  ;;  %832 = vadd.xlane.f32.xlu0 %v831_v12  ;;  %1754 = vmatpush3.msra.mxu0 %v877_v9  ;;  %1843 = vpow2.f32 %v822_v8  ;;  %v1517_v8 = vld [vmem:[#allocation7 + $0x8] sm:$0xff] }
 0x375   :  { %1763 = vmatprep.subr.mxu0 %v1966_v10  ;;  %1845 = vpow2.f32 %v824_v7  ;;  %v1516_v7 = vld [vmem:[#allocation7] sm:$0xff] }
 0x376   :  { %v826_v15 = vmul.f32 1.442695, %v811_v13  ;;  %v1812_v11 = vpack.c.bf16 %v1517_v8, %v1516_v7 }
 0x377   :  { %v953_v16 = vpop.permute.xlu0 %952  ;;  %v1029_v35 = vpop.permute.xlu1 %1028 }
 0x378   :  { %1847 = vpow2.f32 %v826_v15  ;;  %1759 = vmatpush3.msra.mxu1 %v953_v16  ;;  %v1519_v15 = vld [vmem:[#allocation7 + $0x18] sm:$0xff] }
 0x379   :  { %1768 = vmatprep.subr.mxu1 %v1966_v10  ;;  %1849 = vpow2.f32 %v816_v14  ;;  %v1518_v14 = vld [vmem:[#allocation7 + $0x10] sm:$0xff] }
 0x37a   :  { %v2172_v20 = vpop.eup %1837 }
 0x37b   :  { %v1840_v21 = vpop.eup %1839  ;;  %v840_v22 = vsel %vm173_vm2, %v2172_v20, 0.0  ;;  %v1181_v34 = vpop.permute.xlu0 %1180 }
 0x37c   :  { %v1842_v23 = vpop.eup %1841  ;;  %841 = vadd.xlane.f32.xlu1 %v840_v22  ;;  %v837_v24 = vsel %vm173_vm2, %v1840_v21, 0.0  ;;  %v1105_v37 = vpop.permute.xlu1 %1104 }
 0x37d   :  { %838 = vadd.xlane.f32.xlu0 %v837_v24  ;;  %v828_v26 = vsel %vm173_vm2, %v1842_v23, 0.0 }
 0x37e   :  { %v1844_v25 = vpop.eup %1843 }
 0x37f   :  { %v2178_v27 = vpop.eup %1845  ;;  %v843_v28 = vsel %vm173_vm2, %v1844_v25, 0.0 }
 0x380   :  { %829 = vadd.xlane.f32.xlu1 %v828_v26  ;;  %v846_v30 = vsel %vm173_vm2, %v2178_v27, 0.0 }
 0x381   :  { %844 = vadd.xlane.f32.xlu0 %v843_v28 }
 0x382   :  { %v1848_v29 = vpop.eup %1847 }
 0x383   :  { %v849_v31 = vsel %vm173_vm2, %v1848_v29, 0.0  ;;  %v2184_v32 = vpop.eup %1849 }
 0x384   :  { %847 = vadd.xlane.f32.xlu1 %v846_v30  ;;  %v834_v33 = vsel %vm173_vm2, %v2184_v32, 0.0 }
 0x385   :  { %850 = vadd.xlane.f32.xlu0 %v849_v31 }
 0x388   :  { %835 = vadd.xlane.f32.xlu1 %v834_v33 }
 0x399   :  { %1256 = vrot.lane.b32.xlu1 %v2089_v17, %s1972_s10 }
 0x39b   :  { %1332 = vrot.lane.b32.xlu0 %v2091_v18, %s1972_s10 }
 0x39d   :  { %1408 = vrot.lane.b32.xlu1 %v2095_v19, %s1972_s10 }
 0x401   :  { %v833_v36 = vpop.xlane.xlu0 %832 }
 0x402   :  { %1851 = vrcp.f32 %v833_v36 }
 0x409   :  { %v842_v38 = vpop.xlane.xlu1 %841 }
 0x40a   :  { %v839_v39 = vpop.xlane.xlu0 %838 }
 0x40b   :  { %1853 = vrcp.f32 %v839_v39 }
 0x40c   :  { %v1852_v40 = vpop.eup %1851 }
 0x40d   :  { %v861_v41 = vmul.f32 0.17677669, %v1852_v40  ;;  %v830_v42 = vpop.xlane.xlu1 %829 }
 0x40e   :  { %1855 = vrcp.f32 %v830_v42  ;;  %v845_v43 = vpop.xlane.xlu0 %844  ;;  %v1655_v42 = vld [vmem:[%s2251_s4] ss:$0 sm:$0xff] }
 0x40f   :  { %v869_v17 = vmul.f32 %v1836_v5, %v861_v41  ;;  %1857 = vrcp.f32 %v845_v43 }
 0x411   :  { %v848_v44 = vpop.xlane.xlu1 %847  ;;  %1761 = vmatmul.mubr.msk.f32.vlgmr.msra.gmra.mrb[12].mxu1 %vm173_vm2, %v869_v17 }
 0x412   :  { %1769 = vmatpush3.msra.mxu1 %v1105_v37  ;;  %v851_v18 = vpop.xlane.xlu0 %850  ;;  %1770 = vmatprep.mubr.msk.f32.mxu1 %vm1969_vm1, %v1966_v10 }
 0x413   :  { %1859 = vrcp.f32 %v851_v18  ;;  %1778 = vmatprep.subr.mxu1 %v1966_v10 }
 0x414   :  { %1861 = vrcp.f32 %v842_v38 }
 0x415   :  { %v1854_v19 = vpop.eup %1853  ;;  %v836_v45 = vpop.xlane.xlu1 %835 }
 0x416   :  { %v863_v46 = vmul.f32 0.17677669, %v1854_v19  ;;  %1863 = vrcp.f32 %v836_v45  ;;  %v1333_v3 = vpop.permute.xlu0 %1332 }
 0x417   :  { %1865 = vrcp.f32 %v848_v44 }
 0x418   :  { %v1856_v47 = vpop.eup %1855  ;;  %v871_v48 = vmul.f32 %v1840_v21, %v863_v46 }
 0x419   :  { %v1858_v49 = vpop.eup %1857  ;;  %v860_v50 = vmul.f32 0.17677669, %v1856_v47  ;;  %v1257_v51 = vpop.permute.xlu1 %1256 }
 0x41a   :  { %v865_v52 = vmul.f32 0.17677669, %v1858_v49  ;;  %1771 = vmatmul.mubr.msk.f32.vlgmr.msra.gmra.mrb[14].mxu1 %vm173_vm2, %v871_v48 }
 0x41b   :  { %v868_v53 = vmul.f32 %v1842_v23, %v860_v50  ;;  %1779 = vmatpush3.msra.mxu1 %v1257_v51  ;;  %1780 = vmatprep.mubr.msk.f32.mxu1 %vm1969_vm1, %v1966_v10 }
 0x41c   :  { %v873_v54 = vmul.f32 %v1844_v25, %v865_v52  ;;  %1788 = vmatprep.subr.mxu1 %v1966_v10 }
 0x41d   :  { %v1860_v55 = vpop.eup %1859  ;;  %1756 = vmatmul.mubr.msk.f32.vlgmr.msra.gmra.mrb[6].mxu0 %vm173_vm2, %v868_v53  ;;  %v1409_v56 = vpop.permute.xlu1 %1408 }
 0x41e   :  { %v867_v57 = vmul.f32 0.17677669, %v1860_v55  ;;  %1764 = vmatpush3.msra.mxu0 %v1029_v35  ;;  %1781 = vmatmul.mubr.msk.f32.vlgmr.msra.gmra.mrb[16].mxu1 %vm173_vm2, %v873_v54  ;;  %v1862_v58 = vpop.eup %1861 }
 0x41f   :  { %1789 = vmatpush3.msra.mxu1 %v1409_v56  ;;  %1790 = vmatprep.mubr.msk.f32.mxu1 %vm1969_vm1, %v1966_v10  ;;  %v864_v62 = vmul.f32 0.17677669, %v1862_v58 }
 0x420   :  { %v1864_v59 = vpop.eup %1863  ;;  %v875_v60 = vmul.f32 %v1848_v29, %v867_v57  ;;  %1765 = vmatprep.mubr.msk.f32.mxu0 %vm1969_vm1, %v1966_v10  ;;  %1773 = vmatprep.subr.mxu0 %v1966_v10 }
 0x421   :  { %v862_v61 = vmul.f32 0.17677669, %v1864_v59  ;;  %v1866_v0 = vpop.eup %1865  ;;  %v872_v1 = vmul.f32 %v2172_v20, %v864_v62  ;;  %v1816_v20 = vpack.c.bf16 %v1519_v15, %v1518_v14 }
 0x422   :  { %1791 = vmatmul.mubr.msk.f32.vlgmr.msra.gmra.mrb[18].mxu1 %vm173_vm2, %v875_v60  ;;  %v866_v2 = vmul.f32 0.17677669, %v1866_v0 }
 0x423   :  { %v870_v63 = vmul.f32 %v2184_v32, %v862_v61 }
 0x424   :  { %v874_v4 = vmul.f32 %v2178_v27, %v866_v2 }
 0x425   :  { %1766 = vmatmul.mubr.msk.f32.vlgmr.msra.gmra.mrb[8].mxu0 %vm173_vm2, %v870_v63 }
 0x426   :  { %1774 = vmatpush3.msra.mxu0 %v1181_v34  ;;  %1775 = vmatprep.mubr.msk.f32.mxu0 %vm1969_vm1, %v1966_v10 }
 0x427   :  { %1783 = vmatprep.subr.mxu0 %v1966_v10 }
 0x429   :  { %1776 = vmatmul.mubr.msk.f32.vlgmr.msra.gmra.mrb[10].mxu0 %vm173_vm2, %v872_v1 }
 0x42a   :  { %1784 = vmatpush3.msra.mxu0 %v1333_v3  ;;  %1785 = vmatprep.mubr.msk.f32.mxu0 %vm1969_vm1, %v1966_v10 }
 0x42b   :  { %1813 = vmatprep.subr.bf16.mxu0 %v1812_v11 }
 0x42d   :  { %1786 = vmatmul.mubr.msk.f32.vlgmr.msra.gmra.mrb[12].mxu0 %vm173_vm2, %v874_v4 }
 0x42e   :  { %1815 = vmatpush3.bf16.msra.mxu0 %v1812_v11 }
 0x42f   :  { %1817 = vmatprep.subr.bf16.mxu0 %v1816_v20 }
 0x432   :  { %1819 = vmatpush3.bf16.msra.mxu0 %v1816_v20 }
 0x4e4   :  { %v1024_v5 = vpop.f32.mrb[12].mxu1 }
 0x4e5   :  { %1485 = vrot.lane.b32.xlu0 %v1024_v5, %s1964_s6  ;;  %v1762_v6 = vpop.f32.mrb[13].mxu1 }
 0x4ed   :  { %v1176_v9 = vpop.f32.mrb[14].mxu1 }
 0x4ee   :  { %v1772_v12 = vpop.f32.mrb[15].mxu1 }
 0x4f0   :  { %v948_v13 = vpop.f32.mrb[6].mxu0 }
 0x4f1   :  { %v1328_v16 = vpop.f32.mrb[16].mxu1  ;;  %v1757_v10 = vpop.f32.mrb[7].mxu0 }
 0x4f2   :  { %1502 = vrot.lane.b32.xlu0 %v1328_v16, %s1964_s6  ;;  %v1782_v21 = vpop.f32.mrb[17].mxu1 }
 0x4f5   :  { %v1480_v22 = vpop.f32.mrb[18].mxu1 }
 0x4f6   :  { %v1792_v23 = vpop.f32.mrb[19].mxu1 }
 0x4f8   :  { %v1100_v24 = vpop.f32.mrb[8].mxu0 }
 0x4f9   :  { %1489 = vrot.lane.b32.xlu1 %v1100_v24, %s1973_s11  ;;  %v1767_v25 = vpop.f32.mrb[9].mxu0 }
 0x4fc   :  { %v1252_v26 = vpop.f32.mrb[10].mxu0 }
 0x4fd   :  { %v1777_v27 = vpop.f32.mrb[11].mxu0  ;;  %1493 = vrot.lane.b32.xlu1 %v1176_v9, %s1974_s12 }
 0x500   :  { %v1404_v28 = vpop.f32.mrb[12].mxu0 }
 0x501   :  { %1510 = vrot.lane.b32.xlu1 %v1480_v22, %s1974_s12  ;;  %1506 = vrot.lane.b32.xlu0 %v1404_v28, %s1973_s11  ;;  %v1787_v29 = vpop.f32.mrb[13].mxu0 }
 0x557   :  { %v1486_v30 = vpop.permute.xlu0 %1485 }
 0x558   :  { %v1496_v32 = vsel %vm173_vm2, %v948_v13, %v1486_v30 }
 0x564   :  { %v1503_v33 = vpop.permute.xlu0 %1502 }
 0x565   :  { %v1513_v37 = vsel %vm173_vm2, %v1252_v26, %v1503_v33 }
 0x56b   :  { %v1490_v31 = vpop.permute.xlu1 %1489 }
 0x56c   :  { %v1498_v34 = vsel %vm1497_vm3, %v1496_v32, %v1490_v31 }
 0x56f   :  { %v1494_v35 = vpop.permute.xlu1 %1493 }
 0x570   :  { %v1500_v36 = vsel %vm1499_vm4, %v1498_v34, %v1494_v35 }
 0x571   :  { %1801 = vmatprep.mubr.msk.f32.mxu0 %vm75_vm0, %v1500_v36 }
 0x573   :  { %v1511_v38 = vpop.permute.xlu1 %1510  ;;  %v1507_v39 = vpop.permute.xlu0 %1506 }
 0x574   :  { %v1514_v40 = vsel %vm1497_vm3, %v1513_v37, %v1507_v39 }
 0x575   :  { %v1515_v41 = vsel %vm1499_vm4, %v1514_v40, %v1511_v38 }
 0x576   :  { %1802 = vmatmul.mubr.msk.f32.vlgmr.msra.gmra.mrb[14].mxu0 %vm75_vm0, %v1515_v41 }
 0x649   :  { %v1803_v43 = vpop.f32.mrb[14].mxu0 }
 0x64a   :  { %v1605_v17 = vadd.f32 %v1803_v43, %v1655_v42  ;;  %v1599_v44 = vpop.f32.mrb[15].mxu0 }
 0x64b   :  { %v1600_v18 = vadd.f32 %v1655_v42, %v1599_v44 }
 0x64c   :  { %1609 = vst.msk [vmem:[#allocation8 + $0x8] sm:$0xff] %vm75_vm0, %v1605_v17 }
 0x64d   :  { %1608 = vst.msk [vmem:[#allocation8] sm:$0xff] %vm75_vm0, %v1600_v18 }
 0x64e   :  { %1944 = shalt.err (!%p1941_p0)
}
 0x64f   :  { %s1945_s18 = scalar_lea.hbm %s2252_s5, 256 }
 0x650   :  { %p1946_p1 = scmp.ne.s32.totalorder %s2252_s5, %s1945_s18  ;;  %p1949_p2 = scmp.lt.u32.totalorder %s1945_s18, %s2252_s5 }
 0x652   :  { %p1951_p3 = pnand %p1949_p2, %p1946_p1 }
 0x654   :  { %1954 = shalt.err (!%p1951_p3)
}
 0x655   :  { %1621 = dma.vmem_to_hbm [thread:$0]  %s1616_s16, 256, %s2252_s5, [#allocation4], %s1963_s30, %s1963_s30, %s1964_s6  }
 0x656   :  { %1959 = dma.done.wait [#allocation4], 256  }
 0x657   :  { %1960 = vsyncadd [#allocation4], 4294967040 }
 0x658   :  { %1625 = vsyncpa [#allocation3], 1 }
 0x659   :  { %1626 = vsyncpa [#allocation6], 1 }
 0x65a   :  { %1627 = vsyncpa [#allocation4], 1 }

</bundles_post_ra>
